<compile_context>
chip_gen: v7x
topology: tpu7x:2x2x1
jax: 0.10.0
libtpu: 0.0.40
codegen_flags: <defaults>
</compile_context>

<pallas_src>
import functools

import jax
import jax.numpy as jnp
from jax.experimental import pallas as pl
from jax.experimental.pallas import tpu as pltpu


NEG_INF = -1e30  # finite "minus infinity": avoids NaN from (-inf) - (-inf)


def _round_up(x, m):
    return ((x + m - 1) // m) * m


def _block_diag_att(att):
    """Per-head attention vectors [H, C] -> block-diagonal [H*C, H] matrix so
    that (h @ blockdiag)[n, h'] = <h[n, h'*C:(h'+1)*C], att[h']>."""
    H, C = att.shape
    eye = jnp.eye(H, dtype=att.dtype)
    return (att[:, :, None] * eye[:, None, :]).reshape(H * C, H)


# ----------------------------------------------------------------------------
# Stage A: shared linear projection + per-head attention coefficients.
# ----------------------------------------------------------------------------
def gat_project_kernel(x_ref, w_ref, att_src_blk_ref, att_dst_blk_ref,
                       h_ref, a_src_ref, a_dst_ref):
    h = jnp.dot(x_ref[...], w_ref[...], preferred_element_type=jnp.float32)
    h_bf = h.astype(jnp.bfloat16)
    a_src_ref[...] = jnp.dot(h_bf, att_src_blk_ref[...],
                             preferred_element_type=jnp.float32)
    a_dst_ref[...] = jnp.dot(h_bf, att_dst_blk_ref[...],
                             preferred_element_type=jnp.float32)
    h_ref[...] = h_bf


# ----------------------------------------------------------------------------
# Stage B: masked attention softmax (online over source tiles) + aggregation
#          + bias + skip-linear + optional ELU / log_softmax epilogue.
# ----------------------------------------------------------------------------
def gat_attn_kernel(a_dst_ref, x_dst_ref, adj_ref, a_src_t_ref, h_src_ref,
                    bias_ref, w_skip_ref, b_skip_ref, out_ref,
                    m_scr, l_scr, acc_scr,
                    *, heads, out_ch, concat, apply_elu, apply_log_softmax):
    j = pl.program_id(1)
    nj = pl.num_programs(1)

    @pl.when(j == 0)
    def _init():
        m_scr[...] = jnp.full_like(m_scr, NEG_INF)
        l_scr[...] = jnp.zeros_like(l_scr)
        acc_scr[...] = jnp.zeros_like(acc_scr)

    a_dst = a_dst_ref[...]             # [TND, H]   f32
    a_src_t = a_src_t_ref[...]         # [H, TNS]   f32  (source dim on lanes)
    h_src = h_src_ref[...]             # [TNS, H*C] bf16
    mask = adj_ref[...] > 0            # [TND, TNS] bool (int8 input)

    for h in range(heads):             # heads is small (4); unrolled
        a_d = a_dst[:, h:h + 1]                            # [TND, 1]
        a_s = a_src_t[h:h + 1, :]                          # [1, TNS]
        logits = a_d + a_s                                 # [TND, TNS]
        logits = jnp.where(logits > 0.0, logits, 0.2 * logits)   # LeakyReLU(0.2)
        logits = jnp.where(mask, logits, NEG_INF)

        m_old = m_scr[h]                                   # [TND, 1]
        m_new = jnp.maximum(m_old, jnp.max(logits, axis=-1, keepdims=True))
        alpha = jnp.exp(m_old - m_new)                     # [TND, 1]
        p = jnp.exp(logits - m_new)                        # [TND, TNS]
        # masked entries underflow to exactly 0 once any real edge sets m_new

        l_scr[h] = alpha * l_scr[h] + jnp.sum(p, axis=-1, keepdims=True)
        hs = h_src[:, h * out_ch:(h + 1) * out_ch]         # [TNS, C] bf16
        part = jnp.dot(p.astype(jnp.bfloat16), hs,
                       preferred_element_type=jnp.float32)  # [TND, C]
        acc_scr[h] = alpha * acc_scr[h] + part
        m_scr[h] = m_new

    @pl.when(j == nj - 1)
    def _finalize():
        outs = []
        for h in range(heads):
            # normalize AFTER the aggregation matmul: [TND, C] divide, EUP recip
            inv = pl.reciprocal(jnp.maximum(l_scr[h], 1e-20), approx=True)
            outs.append(acc_scr[h] * inv)
        if concat:
            out = jnp.concatenate(outs, axis=-1)           # [TND, H*C]
        else:
            s = outs[0]
            for t in outs[1:]:
                s = s + t
            out = s * (1.0 / heads)                        # [TND, C]
        out = out + bias_ref[...]

        skip = jnp.dot(x_dst_ref[...], w_skip_ref[...],
                       preferred_element_type=jnp.float32) + b_skip_ref[...]
        y = out + skip

        if apply_elu:
            y = jnp.where(y > 0.0, y, jnp.exp(jnp.minimum(y, 0.0)) - 1.0)
        if apply_log_softmax:
            mx = jnp.max(y, axis=-1, keepdims=True)
            z = y - mx
            y = z - jnp.log(jnp.sum(jnp.exp(z), axis=-1, keepdims=True))

        out_ref[...] = y


# ----------------------------------------------------------------------------
# One GAT layer (bipartite GATConv + skip Linear + optional ELU / log_softmax)
# ----------------------------------------------------------------------------
def gat_layer(x_src, adj, W, att_src, att_dst, bias, W_skip, b_skip, *,
              n_dst, heads, out_ch, concat, apply_elu, apply_log_softmax,
              tile_nd=128, tile_ns=128):
    n_src, fin = x_src.shape
    hc = heads * out_ch
    out_dim = hc if concat else out_ch

    ns_pad = _round_up(n_src, tile_ns)
    nd_pad = _round_up(n_dst, tile_nd)
    assert nd_pad <= ns_pad, "targets must be a prefix of the sources"

    # Pad node dims; padded rows/cols are zero / fully masked and sliced away.
    x_p = jnp.pad(x_src.astype(jnp.bfloat16), ((0, ns_pad - n_src), (0, 0)))
    adj_p = jnp.pad(adj.astype(jnp.int8),
                    ((0, nd_pad - n_dst), (0, ns_pad - n_src)))

    w_bf = W.astype(jnp.bfloat16)
    att_src_blk = _block_diag_att(att_src).astype(jnp.bfloat16)
    att_dst_blk = _block_diag_att(att_dst).astype(jnp.bfloat16)

    n_ns = ns_pad // tile_ns
    n_nd = nd_pad // tile_nd

    # ---- Stage A: every source node projected exactly once ----
    h_all, a_src_all, a_dst_all = pl.pallas_call(
        gat_project_kernel,
        out_shape=(
            jax.ShapeDtypeStruct((ns_pad, hc), jnp.bfloat16),
            jax.ShapeDtypeStruct((ns_pad, heads), jnp.float32),
            jax.ShapeDtypeStruct((ns_pad, heads), jnp.float32),
        ),
        grid_spec=pltpu.PrefetchScalarGridSpec(
            num_scalar_prefetch=0,
            grid=(n_ns,),
            in_specs=[
                pl.BlockSpec((tile_ns, fin), lambda j: (j, 0)),
                pl.BlockSpec((fin, hc), lambda j: (0, 0)),
                pl.BlockSpec((hc, heads), lambda j: (0, 0)),
                pl.BlockSpec((hc, heads), lambda j: (0, 0)),
            ],
            out_specs=(
                pl.BlockSpec((tile_ns, hc), lambda j: (j, 0)),
                pl.BlockSpec((tile_ns, heads), lambda j: (j, 0)),
                pl.BlockSpec((tile_ns, heads), lambda j: (j, 0)),
            ),
        ),
        compiler_params=pltpu.CompilerParams(
            dimension_semantics=("parallel",)),
    )(x_p, w_bf, att_src_blk, att_dst_blk)

    # Targets are the first n_dst sources: reuse the prefix (tiny host-side ops).
    a_src_t = a_src_all.T            # [H, ns_pad]  (source dim lane-major)
    a_dst = a_dst_all[:nd_pad]       # [nd_pad, H]
    x_dst = x_p[:nd_pad]             # [nd_pad, fin] bf16 (for the skip Linear)

    kernel = functools.partial(
        gat_attn_kernel, heads=heads, out_ch=out_ch, concat=concat,
        apply_elu=apply_elu, apply_log_softmax=apply_log_softmax)

    out_p = pl.pallas_call(
        kernel,
        out_shape=jax.ShapeDtypeStruct((nd_pad, out_dim), jnp.float32),
        grid_spec=pltpu.PrefetchScalarGridSpec(
            num_scalar_prefetch=0,
            grid=(n_nd, n_ns),
            in_specs=[
                pl.BlockSpec((tile_nd, heads), lambda i, j: (i, 0)),    # a_dst
                pl.BlockSpec((tile_nd, fin), lambda i, j: (i, 0)),      # x_dst
                pl.BlockSpec((tile_nd, tile_ns), lambda i, j: (i, j)),  # adj (int8)
                pl.BlockSpec((heads, tile_ns), lambda i, j: (0, j)),    # a_src_t
                pl.BlockSpec((tile_ns, hc), lambda i, j: (j, 0)),       # h_src
                pl.BlockSpec((1, out_dim), lambda i, j: (0, 0)),        # bias
                pl.BlockSpec((fin, out_dim), lambda i, j: (0, 0)),      # W_skip
                pl.BlockSpec((1, out_dim), lambda i, j: (0, 0)),        # b_skip
            ],
            out_specs=pl.BlockSpec((tile_nd, out_dim), lambda i, j: (i, 0)),
            scratch_shapes=[
                pltpu.VMEM((heads, tile_nd, 1), jnp.float32),       # running max
                pltpu.VMEM((heads, tile_nd, 1), jnp.float32),       # running denom
                pltpu.VMEM((heads, tile_nd, out_ch), jnp.float32),  # running acc
            ],
        ),
        compiler_params=pltpu.CompilerParams(
            dimension_semantics=("parallel", "arbitrary")),
    )(a_dst, x_dst, adj_p, a_src_t, h_all,
      bias.reshape(1, -1), W_skip.astype(jnp.bfloat16), b_skip.reshape(1, -1))

    return out_p[:n_dst]


# ----------------------------------------------------------------------------
# Model: parameters + forward (mirrors GAT.forward with num_layers = 2)
# ----------------------------------------------------------------------------
def init_gat_params(key, in_channels, hidden_channels, out_channels, heads):
    ks = jax.random.split(key, 12)
    p = {}
    # Layer 0: GATConv(in_channels, hidden_channels, heads, concat=True)
    p["W0"] = 0.1 * jax.random.normal(ks[0], (in_channels, heads * hidden_channels), jnp.float32)
    p["att_src0"] = 0.1 * jax.random.normal(ks[1], (heads, hidden_channels), jnp.float32)
    p["att_dst0"] = 0.1 * jax.random.normal(ks[2], (heads, hidden_channels), jnp.float32)
    p["b0"] = 0.01 * jax.random.normal(ks[3], (heads * hidden_channels,), jnp.float32)
    # skip 0: Linear(in_channels, hidden_channels * heads)
    p["Ws0"] = 0.1 * jax.random.normal(ks[4], (in_channels, heads * hidden_channels), jnp.float32)
    p["bs0"] = 0.01 * jax.random.normal(ks[5], (heads * hidden_channels,), jnp.float32)
    # Layer 1: GATConv(heads * hidden, out_channels, heads, concat=False)
    p["W1"] = 0.1 * jax.random.normal(ks[6], (heads * hidden_channels, heads * out_channels), jnp.float32)
    p["att_src1"] = 0.1 * jax.random.normal(ks[7], (heads, out_channels), jnp.float32)
    p["att_dst1"] = 0.1 * jax.random.normal(ks[8], (heads, out_channels), jnp.float32)
    p["b1"] = 0.01 * jax.random.normal(ks[9], (out_channels,), jnp.float32)
    # skip 1: Linear(heads * hidden, out_channels)
    p["Ws1"] = 0.1 * jax.random.normal(ks[10], (heads * hidden_channels, out_channels), jnp.float32)
    p["bs1"] = 0.01 * jax.random.normal(ks[11], (out_channels,), jnp.float32)
    return p


def gat_forward(params, x, adjs, *, hidden_channels, out_channels, heads):
    # adjs: list of (adj_mask int8 [Nd, Ns], (Ns, Nd)) — analogue of (edge_index, _, size)
    num_layers = len(adjs)
    for i, (adj, size) in enumerate(adjs):
        last = (i == num_layers - 1)
        if i == 0:
            x = gat_layer(x, adj,
                          params["W0"], params["att_src0"], params["att_dst0"], params["b0"],
                          params["Ws0"], params["bs0"],
                          n_dst=size[1], heads=heads, out_ch=hidden_channels,
                          concat=True, apply_elu=not last, apply_log_softmax=last)
        else:
            x = gat_layer(x, adj,
                          params["W1"], params["att_src1"], params["att_dst1"], params["b1"],
                          params["Ws1"], params["bs1"],
                          n_dst=size[1], heads=heads, out_ch=out_channels,
                          concat=False, apply_elu=not last, apply_log_softmax=last)
        # TODO(synk): dropout(p=0.5) is identity in eval mode; training masks not implemented.
    return x   # log_softmax already fused into the last layer's epilogue


if __name__ == "__main__":
    key = jax.random.PRNGKey(0)
    k_x, k_a0, k_a1, k_p = jax.random.split(key, 4)

    # Small synthetic shapes.
    in_channels, hidden_channels, out_channels, heads = 32, 16, 8, 4
    N0, N1, N2 = 16, 12, 8   # node counts per sampled hop (targets = prefix of sources)

    x = jax.random.normal(k_x, (N0, in_channels), jnp.float32)

    def make_adj(k, n_dst, n_src):
        a = jax.random.bernoulli(k, 0.4, (n_dst, n_src)).astype(jnp.int8)
        idx = jnp.arange(n_dst)
        return a.at[idx, idx].set(1)   # add_self_loops (targets are first n_dst sources)

    adjs = [
        (make_adj(k_a0, N1, N0), (N0, N1)),
        (make_adj(k_a1, N2, N1), (N1, N2)),
    ]

    params = init_gat_params(k_p, in_channels, hidden_channels, out_channels, heads)

    out = gat_forward(params, x, adjs,
                      hidden_channels=hidden_channels,
                      out_channels=out_channels, heads=heads)
    out = jax.block_until_ready(out)

    assert out.shape == (N2, out_channels)
    assert bool(jnp.all(jnp.isfinite(out)))
    # rows of log_softmax must sum (in prob space) to 1
    assert bool(jnp.allclose(jnp.sum(jnp.exp(out), axis=-1), 1.0, atol=1e-4))
    print("KERNEL_OK")
</pallas_src>

<mosaic_0001>
module attributes {stable_mosaic.version = 11 : i64} {
  func.func @gat_project_kernel(%arg0: i32, %arg1: memref<128x32xbf16, #tpu.memory_space<vmem>>, %arg2: memref<32x64xbf16, #tpu.memory_space<vmem>>, %arg3: memref<64x4xbf16, #tpu.memory_space<vmem>>, %arg4: memref<64x4xbf16, #tpu.memory_space<vmem>>, %arg5: memref<128x64xbf16, #tpu.memory_space<vmem>>, %arg6: memref<128x4xf32, #tpu.memory_space<vmem>>, %arg7: memref<128x4xf32, #tpu.memory_space<vmem>>) attributes {dimension_semantics = [#tpu.dimension_semantics<parallel>], iteration_bounds = array<i64: 1>, scalar_prefetch = 0 : i64, scratch_operands = 0 : i64, tpu.core_type = #tpu.core_type<tc>, window_params = [{transform_indices = @transform_0, window_bounds = array<i64: 128, 32>}, {pipeline_mode = #tpu.pipeline_mode<synchronous>, transform_indices = @transform_1, window_bounds = array<i64: 32, 64>}, {pipeline_mode = #tpu.pipeline_mode<synchronous>, transform_indices = @transform_2, window_bounds = array<i64: 64, 4>}, {pipeline_mode = #tpu.pipeline_mode<synchronous>, transform_indices = @transform_3, window_bounds = array<i64: 64, 4>}, {transform_indices = @transform_4, window_bounds = array<i64: 128, 64>}, {transform_indices = @transform_5, window_bounds = array<i64: 128, 4>}, {transform_indices = @transform_6, window_bounds = array<i64: 128, 4>}]} {
    %c0 = arith.constant 0 : index
    %c0_0 = arith.constant 0 : index
    %0 = vector.load %arg1[%c0, %c0_0] : memref<128x32xbf16, #tpu.memory_space<vmem>>, vector<128x32xbf16>
    %c0_1 = arith.constant 0 : index
    %c0_2 = arith.constant 0 : index
    %1 = vector.load %arg2[%c0_1, %c0_2] : memref<32x64xbf16, #tpu.memory_space<vmem>>, vector<32x64xbf16>
    %cst = arith.constant dense<0.000000e+00> : vector<128x64xf32>
    %2 = tpu.matmul %0, %1, %cst {dimension_numbers = #tpu.dot_dimension_numbers<[1], [0], [0], [1], [0, 0, 1, 1], [], []>} : vector<128x32xbf16>, vector<32x64xbf16>, vector<128x64xf32> -> vector<128x64xf32>
    %3 = arith.truncf %2 : vector<128x64xf32> to vector<128x64xbf16>
    %c0_3 = arith.constant 0 : index
    %c0_4 = arith.constant 0 : index
    %4 = vector.load %arg3[%c0_3, %c0_4] : memref<64x4xbf16, #tpu.memory_space<vmem>>, vector<64x4xbf16>
    %cst_5 = arith.constant dense<0.000000e+00> : vector<128x4xf32>
    %5 = tpu.matmul %3, %4, %cst_5 {dimension_numbers = #tpu.dot_dimension_numbers<[1], [0], [0], [1], [0, 0, 1, 1], [], []>} : vector<128x64xbf16>, vector<64x4xbf16>, vector<128x4xf32> -> vector<128x4xf32>
    %c0_6 = arith.constant 0 : index
    %c0_7 = arith.constant 0 : index
    %6 = vector.load %arg6[%c0_6, %c0_7] : memref<128x4xf32, #tpu.memory_space<vmem>>, vector<128x4xf32>
    tpu.vector_store %arg6[%c0_6, %c0_7], %5 {strides = array<i32>} : memref<128x4xf32, #tpu.memory_space<vmem>>, vector<128x4xf32>,
    %c0_8 = arith.constant 0 : index
    %c0_9 = arith.constant 0 : index
    %7 = vector.load %arg4[%c0_8, %c0_9] : memref<64x4xbf16, #tpu.memory_space<vmem>>, vector<64x4xbf16>
    %cst_10 = arith.constant dense<0.000000e+00> : vector<128x4xf32>
    %8 = tpu.matmul %3, %7, %cst_10 {dimension_numbers = #tpu.dot_dimension_numbers<[1], [0], [0], [1], [0, 0, 1, 1], [], []>} : vector<128x64xbf16>, vector<64x4xbf16>, vector<128x4xf32> -> vector<128x4xf32>
    %c0_11 = arith.constant 0 : index
    %c0_12 = arith.constant 0 : index
    %9 = vector.load %arg7[%c0_11, %c0_12] : memref<128x4xf32, #tpu.memory_space<vmem>>, vector<128x4xf32>
    tpu.vector_store %arg7[%c0_11, %c0_12], %8 {strides = array<i32>} : memref<128x4xf32, #tpu.memory_space<vmem>>, vector<128x4xf32>,
    %c0_13 = arith.constant 0 : index
    %c0_14 = arith.constant 0 : index
    %10 = vector.load %arg5[%c0_13, %c0_14] : memref<128x64xbf16, #tpu.memory_space<vmem>>, vector<128x64xbf16>
    tpu.vector_store %arg5[%c0_13, %c0_14], %3 {strides = array<i32>} : memref<128x64xbf16, #tpu.memory_space<vmem>>, vector<128x64xbf16>,
    return
  }
  func.func @transform_0(%arg0: i32) -> (i32, i32) {
    %c0_i32 = arith.constant 0 : i32
    %c0_i32_0 = arith.constant 0 : i32
    return %arg0, %c0_i32 : i32, i32
  }
  func.func @transform_1(%arg0: i32) -> (i32, i32) {
    %c0_i32 = arith.constant 0 : i32
    %c0_i32_0 = arith.constant 0 : i32
    %c0_i32_1 = arith.constant 0 : i32
    return %c0_i32, %c0_i32_0 : i32, i32
  }
  func.func @transform_2(%arg0: i32) -> (i32, i32) {
    %c0_i32 = arith.constant 0 : i32
    %c0_i32_0 = arith.constant 0 : i32
    %c0_i32_1 = arith.constant 0 : i32
    return %c0_i32, %c0_i32_0 : i32, i32
  }
  func.func @transform_3(%arg0: i32) -> (i32, i32) {
    %c0_i32 = arith.constant 0 : i32
    %c0_i32_0 = arith.constant 0 : i32
    %c0_i32_1 = arith.constant 0 : i32
    return %c0_i32, %c0_i32_0 : i32, i32
  }
  func.func @transform_4(%arg0: i32) -> (i32, i32) {
    %c0_i32 = arith.constant 0 : i32
    %c0_i32_0 = arith.constant 0 : i32
    return %arg0, %c0_i32 : i32, i32
  }
  func.func @transform_5(%arg0: i32) -> (i32, i32) {
    %c0_i32 = arith.constant 0 : i32
    %c0_i32_0 = arith.constant 0 : i32
    return %arg0, %c0_i32 : i32, i32
  }
  func.func @transform_6(%arg0: i32) -> (i32, i32) {
    %c0_i32 = arith.constant 0 : i32
    %c0_i32_0 = arith.constant 0 : i32
    return %arg0, %c0_i32 : i32, i32
  }
}

</mosaic_0001>

<bundles_post_ra>
// kernel: tpu_custom_call.1
= control target key start
LH: loop header
LB: loop body
LE: loop exit
PB: predicated region body
PF: predicated region fallthrough
CT: control target
= control target key end

     0   :  { %vm93_vm0 = vcmask 261120   ;;  %vm595_vm1 = vcmask 519168   ;;  %vm255_vm2 = vcmask 523264   ;;  %vm377_vm3 = vcmask 31744   ;;  %s1127_s1 = inlined_call_operand.vmem [shape: bf16[32,64], index: 1, kind: input, shape index: {}]   ;;  %s1128_s0 = inlined_call_operand.vmem [shape: bf16[128,32], index: 0, kind: input, shape index: {}]   ;;  %s1129_s2 = inlined_call_operand.vmem [shape: bf16[64,4], index: 2, kind: input, shape index: {}]   ;;  %s1130_s3 = inlined_call_operand.vmem [shape: bf16[64,4], index: 3, kind: input, shape index: {}]   ;;  %s1131_s4 = inlined_call_operand.vmem [shape: bf16[128,64], index: 4, kind: output, shape index: {0}]   ;;  %s1132_s5 = inlined_call_operand.vmem [shape: f32[128,4], index: 5, kind: output, shape index: {1}]   ;;  %s1133_s6 = inlined_call_operand.vmem [shape: f32[128,4], index: 6, kind: output, shape index: {2}]  }
   0x1   :  { %v804_v0 = vld [vmem:[%s1127_s1] sm:$0xff]   ;;  %v805_v1 = vld [vmem:[%s1127_s1 + $0x8] sm:$0xff]   ;;  %v808_v4 = vld [vmem:[%s1128_s0 + $0x10] sm:$0xff]  }
   0x2   :  { %732 = vmatprep.subr.bf16.mxu0 %v804_v0  ;;  %v806_v2 = vld [vmem:[%s1128_s0] sm:$0xff]   ;;  %800 = vmatprep.subr.bf16.mxu1 %v804_v0  ;;  %v807_v3 = vld [vmem:[%s1128_s0 + $0x8] sm:$0xff]   ;;  %v812_v7 = vld [vmem:[%s1128_s0 + $0x30] sm:$0xff]  }
   0x3   :  { %733 = vmatpush3.bf16.msra.mxu0 %v804_v0  ;;  %802 = vmatpush3.bf16.msra.mxu1 %v804_v0  ;;  %v810_v5 = vld [vmem:[%s1128_s0 + $0x20] sm:$0xff]   ;;  %v811_v6 = vld [vmem:[%s1128_s0 + $0x28] sm:$0xff]   ;;  %v809_v10 = vld [vmem:[%s1128_s0 + $0x18] sm:$0xff]  }
   0x4   :  { %734 = vmatprep.subr.bf16.mxu0 %v805_v1  ;;  %736 = vmatprep.mubr.msk.bf16.mxu0 %vm93_vm0, %v806_v2  ;;  %v814_v8 = vld [vmem:[%s1129_s2] sm:$0xff]   ;;  %v813_v11 = vld [vmem:[%s1128_s0 + $0x38] sm:$0xff]   ;;  %v816_v12 = vld [vmem:[%s1129_s2 + $0x8] sm:$0xff]  }
   0x5   :  { %801 = vmatprep.subr.bf16.mxu1 %v805_v1  ;;  %744 = vmatprep.mubr.msk.bf16.mxu1 %vm93_vm0, %v810_v5  ;;  %v815_v9 = vld [vmem:[%s1130_s3] sm:$0xff]   ;;  %v817_v13 = vld [vmem:[%s1130_s3 + $0x8] sm:$0xff]   ;;  %v818_v14 = vld [vmem:[%s1129_s2 + $0x10] sm:$0xff]  }
   0x6   :  { %v819_v15 = vld [vmem:[%s1130_s3 + $0x10] sm:$0xff]   ;;  %v820_v16 = vld [vmem:[%s1129_s2 + $0x18] sm:$0xff]  }
   0x7   :  { %735 = vmatpush3.bf16.msra.mxu0 %v805_v1  ;;  %803 = vmatpush3.bf16.msra.mxu1 %v805_v1  ;;  %v821_v17 = vld [vmem:[%s1130_s3 + $0x18] sm:$0xff]  }
   0x8   :  { %752 = vmatprep.subr.bf16.mxu1 %v814_v8  ;;  %776 = vmatprep.subr.bf16.mxu0 %v815_v9 }
   0xa   :  { %737 = vmatmul.mubr.msk.bf16.vlgmr.msra.gmra.mrb[0].mxu0 %vm93_vm0, %v807_v3  ;;  %745 = vmatmul.mubr.msk.bf16.vlgmr.msra.gmra.mrb[0].mxu1 %vm93_vm0, %v811_v6 }
   0xb   :  { %740 = vmatprep.mubr.msk.bf16.mxu0 %vm93_vm0, %v808_v4  ;;  %748 = vmatprep.mubr.msk.bf16.mxu1 %vm93_vm0, %v812_v7 }
   0xc   :  { %753 = vmatpush3.bf16.msra.mxu1 %v814_v8  ;;  %777 = vmatpush3.bf16.msra.mxu0 %v815_v9 }
   0xd   :  { %754 = vmatprep.subr.bf16.mxu1 %v816_v12  ;;  %778 = vmatprep.subr.bf16.mxu0 %v817_v13 }
  0x10   :  { %755 = vmatpush3.bf16.msra.mxu1 %v816_v12  ;;  %779 = vmatpush3.bf16.msra.mxu0 %v817_v13 }
  0x11   :  { %756 = vmatprep.subr.bf16.mxu1 %v818_v14  ;;  %780 = vmatprep.subr.bf16.mxu0 %v819_v15 }
  0x12   :  { %741 = vmatmul.mubr.msk.bf16.gmra.mrb[4].mxu0 %vm93_vm0, %v809_v10  ;;  %749 = vmatmul.mubr.msk.bf16.gmra.mrb[4].mxu1 %vm93_vm0, %v813_v11 }
  0x14   :  { %757 = vmatpush3.bf16.msra.mxu1 %v818_v14  ;;  %781 = vmatpush3.bf16.msra.mxu0 %v819_v15 }
  0x15   :  { %758 = vmatprep.subr.bf16.mxu1 %v820_v16  ;;  %782 = vmatprep.subr.bf16.mxu0 %v821_v17 }
  0x18   :  { %759 = vmatpush3.bf16.msra.mxu1 %v820_v16  ;;  %783 = vmatpush3.bf16.msra.mxu0 %v821_v17 }
  0xdd   :  { %v738_v18 = vpop.f32.mrb[0].mxu0  ;;  %v746_v19 = vpop.f32.mrb[0].mxu1 }
  0xde   :  { %v684_v20 = vpack.c.bf16 %v738_v18, %v738_v18  ;;  %v152_v21 = vpop.f32.mrb[1].mxu0  ;;  %v692_v22 = vpack.c.bf16 %v746_v19, %v746_v19  ;;  %v184_v23 = vpop.f32.mrb[1].mxu1 }
  0xdf   :  { %v682_v24 = vpack.c.bf16 %v152_v21, %v152_v21  ;;  %v739_v25 = vpop.f32.mrb[2].mxu0  ;;  %v690_v26 = vpack.c.bf16 %v184_v23, %v184_v23  ;;  %v747_v27 = vpop.f32.mrb[2].mxu1 }
  0xe0   :  { %598 = vst.msk [vmem:[%s1131_s4 + $0x8] sm:$0xf] %vm595_vm1, %v684_v20  ;;  %v216_v28 = vpack.c.bf16 %v739_v25, %v738_v18  ;;  %v685_v29 = vpack.c.bf16 %v739_v25, %v739_v25  ;;  %v155_v30 = vpop.f32.mrb[3].mxu0  ;;  %606 = vst.msk [vmem:[%s1131_s4 + $0x28] sm:$0xf] %vm595_vm1, %v692_v22  ;;  %v220_v31 = vpack.c.bf16 %v747_v27, %v746_v19  ;;  %v187_v33 = vpop.f32.mrb[3].mxu1 }
  0xe1   :  { %v693_v32 = vpack.c.bf16 %v747_v27, %v747_v27  ;;  %596 = vst.msk [vmem:[%s1131_s4] sm:$0xf] %vm595_vm1, %v682_v24  ;;  %v215_v34 = vpack.c.bf16 %v155_v30, %v152_v21  ;;  %v683_v35 = vpack.c.bf16 %v155_v30, %v155_v30  ;;  %604 = vst.msk [vmem:[%s1131_s4 + $0x20] sm:$0xf] %vm595_vm1, %v690_v26 }
  0xe2   :  { %v219_v36 = vpack.c.bf16 %v187_v33, %v184_v23  ;;  %v691_v37 = vpack.c.bf16 %v187_v33, %v187_v33  ;;  %599 = vst.msk [vmem:[%s1131_s4 + $0xc] sm:$0xf] %vm595_vm1, %v685_v29 }
  0xe3   :  { %607 = vst.msk [vmem:[%s1131_s4 + $0x2c] sm:$0xf] %vm595_vm1, %v693_v32  ;;  %597 = vst.msk [vmem:[%s1131_s4 + $0x4] sm:$0xf] %vm595_vm1, %v683_v35  ;;  %760 = vmatprep.mubr.msk.bf16.mxu1 %vm255_vm2, %v215_v34  ;;  %784 = vmatprep.mubr.msk.bf16.mxu0 %vm255_vm2, %v215_v34 }
  0xe4   :  { %605 = vst.msk [vmem:[%s1131_s4 + $0x24] sm:$0xf] %vm595_vm1, %v691_v37  ;;  %761 = vmatmul.mubr.msk.bf16.vlgmr.msra.gmra.mrb[8].mxu1 %vm255_vm2, %v216_v28  ;;  %785 = vmatmul.mubr.msk.bf16.vlgmr.msra.gmra.mrb[8].mxu0 %vm255_vm2, %v216_v28 }
  0xe5   :  { %v742_v38 = vpop.f32.mrb[4].mxu0  ;;  %v750_v39 = vpop.f32.mrb[4].mxu1 }
  0xe6   :  { %v688_v40 = vpack.c.bf16 %v742_v38, %v742_v38  ;;  %v168_v41 = vpop.f32.mrb[5].mxu0  ;;  %v696_v42 = vpack.c.bf16 %v750_v39, %v750_v39  ;;  %v200_v43 = vpop.f32.mrb[5].mxu1 }
  0xe7   :  { %v686_v44 = vpack.c.bf16 %v168_v41, %v168_v41  ;;  %v743_v45 = vpop.f32.mrb[6].mxu0  ;;  %v694_v46 = vpack.c.bf16 %v200_v43, %v200_v43  ;;  %v751_v47 = vpop.f32.mrb[6].mxu1 }
  0xe8   :  { %602 = vst.msk [vmem:[%s1131_s4 + $0x18] sm:$0xf] %vm595_vm1, %v688_v40  ;;  %v218_v48 = vpack.c.bf16 %v743_v45, %v742_v38  ;;  %v689_v49 = vpack.c.bf16 %v743_v45, %v743_v45  ;;  %v171_v50 = vpop.f32.mrb[7].mxu0  ;;  %610 = vst.msk [vmem:[%s1131_s4 + $0x38] sm:$0xf] %vm595_vm1, %v696_v42  ;;  %v222_v51 = vpack.c.bf16 %v751_v47, %v750_v39  ;;  %v203_v53 = vpop.f32.mrb[7].mxu1 }
  0xe9   :  { %v697_v52 = vpack.c.bf16 %v751_v47, %v751_v47  ;;  %600 = vst.msk [vmem:[%s1131_s4 + $0x10] sm:$0xf] %vm595_vm1, %v686_v44  ;;  %v217_v54 = vpack.c.bf16 %v171_v50, %v168_v41  ;;  %v687_v55 = vpack.c.bf16 %v171_v50, %v171_v50  ;;  %608 = vst.msk [vmem:[%s1131_s4 + $0x30] sm:$0xf] %vm595_vm1, %v694_v46 }
  0xea   :  { %v221_v56 = vpack.c.bf16 %v203_v53, %v200_v43  ;;  %v695_v57 = vpack.c.bf16 %v203_v53, %v203_v53  ;;  %603 = vst.msk [vmem:[%s1131_s4 + $0x1c] sm:$0xf] %vm595_vm1, %v689_v49 }
  0xeb   :  { %611 = vst.msk [vmem:[%s1131_s4 + $0x3c] sm:$0xf] %vm595_vm1, %v697_v52  ;;  %601 = vst.msk [vmem:[%s1131_s4 + $0x14] sm:$0xf] %vm595_vm1, %v687_v55  ;;  %764 = vmatprep.mubr.msk.bf16.mxu1 %vm255_vm2, %v217_v54  ;;  %788 = vmatprep.mubr.msk.bf16.mxu0 %vm255_vm2, %v217_v54 }
  0xec   :  { %609 = vst.msk [vmem:[%s1131_s4 + $0x34] sm:$0xf] %vm595_vm1, %v695_v57  ;;  %765 = vmatmul.mubr.msk.bf16.gmra.mrb[12].mxu1 %vm255_vm2, %v218_v48  ;;  %789 = vmatmul.mubr.msk.bf16.gmra.mrb[12].mxu0 %vm255_vm2, %v218_v48 }
  0xed   :  { %768 = vmatprep.mubr.msk.bf16.mxu1 %vm255_vm2, %v219_v36  ;;  %792 = vmatprep.mubr.msk.bf16.mxu0 %vm255_vm2, %v219_v36 }
  0xf4   :  { %769 = vmatmul.mubr.msk.bf16.gmra.mrb[16].mxu1 %vm255_vm2, %v220_v31  ;;  %793 = vmatmul.mubr.msk.bf16.gmra.mrb[16].mxu0 %vm255_vm2, %v220_v31 }
  0xf5   :  { %772 = vmatprep.mubr.msk.bf16.mxu1 %vm255_vm2, %v221_v56  ;;  %796 = vmatprep.mubr.msk.bf16.mxu0 %vm255_vm2, %v221_v56 }
  0xfc   :  { %773 = vmatmul.mubr.msk.bf16.gmra.mrb[20].mxu1 %vm255_vm2, %v222_v51  ;;  %797 = vmatmul.mubr.msk.bf16.gmra.mrb[20].mxu0 %vm255_vm2, %v222_v51 }
 0x1b7   :  { %v762_v58 = vpop.f32.mrb[8].mxu1  ;;  %v786_v59 = vpop.f32.mrb[8].mxu0 }
 0x1b8   :  { %380 = vst.msk [vmem:[%s1132_s5 + $0x10] sm:$0xff] %vm377_vm3, %v762_v58  ;;  %525 = vst.msk [vmem:[%s1133_s6 + $0x10] sm:$0xff] %vm377_vm3, %v786_v59  ;;  %v314_v60 = vpop.f32.mrb[9].mxu1  ;;  %v460_v61 = vpop.f32.mrb[9].mxu0 }
 0x1b9   :  { %378 = vst.msk [vmem:[%s1132_s5] sm:$0xff] %vm377_vm3, %v314_v60  ;;  %523 = vst.msk [vmem:[%s1133_s6] sm:$0xff] %vm377_vm3, %v460_v61  ;;  %v763_v62 = vpop.f32.mrb[10].mxu1  ;;  %v787_v63 = vpop.f32.mrb[10].mxu0 }
 0x1ba   :  { %381 = vst.msk [vmem:[%s1132_s5 + $0x18] sm:$0xff] %vm377_vm3, %v763_v62  ;;  %526 = vst.msk [vmem:[%s1133_s6 + $0x18] sm:$0xff] %vm377_vm3, %v787_v63  ;;  %v317_v0 = vpop.f32.mrb[11].mxu1  ;;  %v463_v1 = vpop.f32.mrb[11].mxu0 }
 0x1bb   :  { %379 = vst.msk [vmem:[%s1132_s5 + $0x8] sm:$0xff] %vm377_vm3, %v317_v0  ;;  %524 = vst.msk [vmem:[%s1133_s6 + $0x8] sm:$0xff] %vm377_vm3, %v463_v1 }
 0x1bf   :  { %v766_v2 = vpop.f32.mrb[12].mxu1  ;;  %v790_v3 = vpop.f32.mrb[12].mxu0 }
 0x1c0   :  { %384 = vst.msk [vmem:[%s1132_s5 + $0x30] sm:$0xff] %vm377_vm3, %v766_v2  ;;  %529 = vst.msk [vmem:[%s1133_s6 + $0x30] sm:$0xff] %vm377_vm3, %v790_v3  ;;  %v330_v4 = vpop.f32.mrb[13].mxu1  ;;  %v476_v5 = vpop.f32.mrb[13].mxu0 }
 0x1c1   :  { %382 = vst.msk [vmem:[%s1132_s5 + $0x20] sm:$0xff] %vm377_vm3, %v330_v4  ;;  %527 = vst.msk [vmem:[%s1133_s6 + $0x20] sm:$0xff] %vm377_vm3, %v476_v5  ;;  %v767_v6 = vpop.f32.mrb[14].mxu1  ;;  %v791_v7 = vpop.f32.mrb[14].mxu0 }
 0x1c2   :  { %385 = vst.msk [vmem:[%s1132_s5 + $0x38] sm:$0xff] %vm377_vm3, %v767_v6  ;;  %530 = vst.msk [vmem:[%s1133_s6 + $0x38] sm:$0xff] %vm377_vm3, %v791_v7  ;;  %v333_v8 = vpop.f32.mrb[15].mxu1  ;;  %v479_v9 = vpop.f32.mrb[15].mxu0 }
 0x1c3   :  { %383 = vst.msk [vmem:[%s1132_s5 + $0x28] sm:$0xff] %vm377_vm3, %v333_v8  ;;  %528 = vst.msk [vmem:[%s1133_s6 + $0x28] sm:$0xff] %vm377_vm3, %v479_v9 }
 0x1c7   :  { %v770_v10 = vpop.f32.mrb[16].mxu1  ;;  %v794_v11 = vpop.f32.mrb[16].mxu0 }
 0x1c8   :  { %388 = vst.msk [vmem:[%s1132_s5 + $0x50] sm:$0xff] %vm377_vm3, %v770_v10  ;;  %533 = vst.msk [vmem:[%s1133_s6 + $0x50] sm:$0xff] %vm377_vm3, %v794_v11  ;;  %v346_v12 = vpop.f32.mrb[17].mxu1  ;;  %v492_v13 = vpop.f32.mrb[17].mxu0 }
 0x1c9   :  { %386 = vst.msk [vmem:[%s1132_s5 + $0x40] sm:$0xff] %vm377_vm3, %v346_v12  ;;  %531 = vst.msk [vmem:[%s1133_s6 + $0x40] sm:$0xff] %vm377_vm3, %v492_v13  ;;  %v771_v14 = vpop.f32.mrb[18].mxu1  ;;  %v795_v15 = vpop.f32.mrb[18].mxu0 }
 0x1ca   :  { %389 = vst.msk [vmem:[%s1132_s5 + $0x58] sm:$0xff] %vm377_vm3, %v771_v14  ;;  %534 = vst.msk [vmem:[%s1133_s6 + $0x58] sm:$0xff] %vm377_vm3, %v795_v15  ;;  %v349_v16 = vpop.f32.mrb[19].mxu1  ;;  %v495_v17 = vpop.f32.mrb[19].mxu0 }
 0x1cb   :  { %387 = vst.msk [vmem:[%s1132_s5 + $0x48] sm:$0xff] %vm377_vm3, %v349_v16  ;;  %532 = vst.msk [vmem:[%s1133_s6 + $0x48] sm:$0xff] %vm377_vm3, %v495_v17 }
 0x1cf   :  { %v774_v18 = vpop.f32.mrb[20].mxu1  ;;  %v798_v19 = vpop.f32.mrb[20].mxu0 }
 0x1d0   :  { %392 = vst.msk [vmem:[%s1132_s5 + $0x70] sm:$0xff] %vm377_vm3, %v774_v18  ;;  %537 = vst.msk [vmem:[%s1133_s6 + $0x70] sm:$0xff] %vm377_vm3, %v798_v19  ;;  %v362_v20 = vpop.f32.mrb[21].mxu1  ;;  %v508_v21 = vpop.f32.mrb[21].mxu0 }
 0x1d1   :  { %390 = vst.msk [vmem:[%s1132_s5 + $0x60] sm:$0xff] %vm377_vm3, %v362_v20  ;;  %535 = vst.msk [vmem:[%s1133_s6 + $0x60] sm:$0xff] %vm377_vm3, %v508_v21  ;;  %v775_v22 = vpop.f32.mrb[22].mxu1  ;;  %v799_v23 = vpop.f32.mrb[22].mxu0 }
 0x1d2   :  { %393 = vst.msk [vmem:[%s1132_s5 + $0x78] sm:$0xff] %vm377_vm3, %v775_v22  ;;  %538 = vst.msk [vmem:[%s1133_s6 + $0x78] sm:$0xff] %vm377_vm3, %v799_v23  ;;  %v365_v24 = vpop.f32.mrb[23].mxu1  ;;  %v511_v25 = vpop.f32.mrb[23].mxu0 }
 0x1d3   :  { %391 = vst.msk [vmem:[%s1132_s5 + $0x68] sm:$0xff] %vm377_vm3, %v365_v24  ;;  %536 = vst.msk [vmem:[%s1133_s6 + $0x68] sm:$0xff] %vm377_vm3, %v511_v25 }

</bundles_post_ra>
